<compile_context>
chip_gen: v7x
topology: tpu7x:2x2x1
jax: 0.10.0
libtpu: 0.0.40
codegen_flags: <defaults>
</compile_context>

<pallas_src>
import jax
import jax.numpy as jnp
from jax.experimental import pallas as pl
from jax.experimental.pallas import tpu as pltpu

INPUT_SIZE = 3
HIDDEN = 128
ACTION_SPACE = 2          # forward() does x.view(1, 2)
OUT_PAD = 128             # fused policy output padded to a full lane tile


def model_kernel(x_sm_ref, h_ref,
                 wiha_ref, whh_ref, bhh_ref,
                 wf_ref, bf_ref,
                 out_ref, hnew_ref):
    H = HIDDEN
    h = h_ref[...]                                     # (1, 128)

    # ---- gi = x @ W_ih^T + b_ih on the VPU: start from the b_ih row (row 3 of wiha) and do
    #      3 scalar-broadcast FMAs over (1, 384) rows; overlaps with the MXU matmul below.
    x0 = x_sm_ref[0]
    x1 = x_sm_ref[1]
    x2 = x_sm_ref[2]
    gi = (wiha_ref[3:4, :]
          + x0 * wiha_ref[0:1, :]
          + x1 * wiha_ref[1:2, :]
          + x2 * wiha_ref[2:3, :])                     # (1, 384), includes b_ih

    # ---- gh = h @ W_hh^T + b_hh on the MXU (1x128 @ 128x384) + one (1,384) bias add.
    gh = jnp.dot(h, whh_ref[...], preferred_element_type=jnp.float32) + bhh_ref[...]

    # ---- GRU cell, PyTorch gate ordering (r, z, n); all slice boundaries are 128-multiples.
    rz = jax.nn.sigmoid(gi[:, :2 * H] + gh[:, :2 * H])                  # (1, 256)
    r = rz[:, :H]
    z = rz[:, H:]
    n = jnp.tanh(gi[:, 2 * H:] + r * gh[:, 2 * H:])                     # (1, 128)
    h_new = (1.0 - z) * n + z * h                                       # (1, 128)
    hnew_ref[...] = h_new

    # ---- Fused dense stack (128->64->32->10->2 collapsed offline; exact since there are no
    #      intervening nonlinearities). Output padded to 128 lanes -> unmasked full-lane store.
    out_ref[...] = (jnp.dot(h_new, wf_ref[...], preferred_element_type=jnp.float32)
                    + bf_ref[...])


def init_params(key):
    """Deterministic init mimicking PyTorch default uniform(-1/sqrt(fan), 1/sqrt(fan)).
    Parameters are stored in native PyTorch shapes (out_features, in_features)."""
    ks = jax.random.split(key, 14)
    u = lambda k, shape, bound: jax.random.uniform(
        k, shape, jnp.float32, minval=-bound, maxval=bound)

    kg = 1.0 / jnp.sqrt(HIDDEN)
    return dict(
        # GRU weights, PyTorch shapes: weight_ih_l0 (3H, in), weight_hh_l0 (3H, H)
        w_ih=u(ks[0], (3 * HIDDEN, INPUT_SIZE), kg),
        w_hh=u(ks[1], (3 * HIDDEN, HIDDEN), kg),
        b_ih=u(ks[2], (3 * HIDDEN,), kg),
        b_hh=u(ks[3], (3 * HIDDEN,), kg),
        # dense1: (64, 128), dense2: (32, 64), dense3: (10, 32), policy: (2, 10)
        w1=u(ks[4], (64, 128), 1.0 / jnp.sqrt(128)),
        b1=u(ks[5], (64,), 1.0 / jnp.sqrt(128)),
        w2=u(ks[6], (32, 64), 1.0 / jnp.sqrt(64)),
        b2=u(ks[7], (32,), 1.0 / jnp.sqrt(64)),
        w3=u(ks[8], (10, 32), 1.0 / jnp.sqrt(32)),
        b3=u(ks[9], (10,), 1.0 / jnp.sqrt(32)),
        wp=u(ks[10], (ACTION_SPACE, 10), 1.0 / jnp.sqrt(10)),
        bp=u(ks[11], (ACTION_SPACE,), 1.0 / jnp.sqrt(10)),
    )


def pack_params(p):
    """One-time repacking (call OUTSIDE the per-step path):
      * transpose GRU weights to (in, out) and append b_ih as a 4th row of W_ih^T;
      * keep b_hh as one (1, 384) row (added once to the MXU result);
      * fuse the activation-free dense stack into one padded affine map.
    Exact up to float reassociation."""
    H = HIDDEN
    hp = jax.lax.Precision.HIGHEST
    w1t = p["w1"].T.astype(jnp.float32)     # (128, 64)
    w2t = p["w2"].T.astype(jnp.float32)     # (64, 32)
    w3t = p["w3"].T.astype(jnp.float32)     # (32, 10)
    wpt = p["wp"].T.astype(jnp.float32)     # (10, A)

    w_fused = jnp.dot(jnp.dot(jnp.dot(w1t, w2t, precision=hp), w3t, precision=hp),
                      wpt, precision=hp)                                   # (128, A)
    b_fused = (jnp.dot(jnp.dot(jnp.dot(p["b1"], w2t, precision=hp) + p["b2"],
                               w3t, precision=hp) + p["b3"],
                       wpt, precision=hp) + p["bp"])                       # (A,)

    wf_pad = jnp.zeros((H, OUT_PAD), jnp.float32).at[:, :ACTION_SPACE].set(w_fused)
    bf_pad = jnp.zeros((1, OUT_PAD), jnp.float32).at[0, :ACTION_SPACE].set(b_fused)

    wih_aug = jnp.concatenate(
        [p["w_ih"].T.astype(jnp.float32),                 # (3, 384)
         p["b_ih"].astype(jnp.float32)[None, :]],         # (1, 384) -> gi initial value
        axis=0)                                           # (4, 384)

    return dict(
        wih_aug=wih_aug,                                  # (4, 384)
        whh_t=p["w_hh"].T.astype(jnp.float32),            # (128, 384)
        b_hh=p["b_hh"].astype(jnp.float32)[None, :],      # (1, 384)
        w_fused=wf_pad,                                   # (128, 128)
        b_fused=bf_pad,                                   # (1, 128)
    )


def model_forward(x, hidden, packed):
    """x: anything reshapeable to (1, 1, 3); hidden: (1, 1, 128); packed: pack_params() output.
    Returns (logits (1, ACTION_SPACE), new_hidden (1, 1, 128))."""
    x_sm = jnp.reshape(x, (INPUT_SIZE,)).astype(jnp.float32)    # SMEM scalars
    h2d = jnp.reshape(hidden, (1, HIDDEN)).astype(jnp.float32)

    vmem = pl.BlockSpec(memory_space=pltpu.MemorySpace.VMEM)
    smem = pl.BlockSpec(memory_space=pltpu.MemorySpace.SMEM)

    out_pad, h_new = pl.pallas_call(
        model_kernel,
        out_shape=(
            jax.ShapeDtypeStruct((1, OUT_PAD), jnp.float32),
            jax.ShapeDtypeStruct((1, HIDDEN), jnp.float32),
        ),
        in_specs=[smem, vmem, vmem, vmem, vmem, vmem, vmem],
        out_specs=(vmem, vmem),
        input_output_aliases={1: 1},   # hidden-state input updated in place
    )(x_sm, h2d,
      packed["wih_aug"], packed["whh_t"], packed["b_hh"],
      packed["w_fused"], packed["b_fused"])

    # Contiguous-prefix slice of the padded policy row; new hidden reshaped to (1, 1, 128).
    return out_pad[:, :ACTION_SPACE], h_new.reshape(1, 1, HIDDEN)


def reference_forward(x, hidden, params):
    """Unfused pure-JAX reference matching PyTorch semantics (for tolerance check)."""
    H = HIDDEN
    x2d = jnp.reshape(x, (1, INPUT_SIZE)).astype(jnp.float32)
    h = jnp.reshape(hidden, (1, HIDDEN)).astype(jnp.float32)
    gi = x2d @ params["w_ih"].T + params["b_ih"]
    gh = h @ params["w_hh"].T + params["b_hh"]
    r = jax.nn.sigmoid(gi[:, :H] + gh[:, :H])
    z = jax.nn.sigmoid(gi[:, H:2 * H] + gh[:, H:2 * H])
    n = jnp.tanh(gi[:, 2 * H:] + r * gh[:, 2 * H:])
    h_new = (1.0 - z) * n + z * h
    y = h_new @ params["w1"].T + params["b1"]
    y = y @ params["w2"].T + params["b2"]
    y = y @ params["w3"].T + params["b3"]
    y = y @ params["wp"].T + params["bp"]
    return y, h_new.reshape(1, 1, HIDDEN)


if __name__ == "__main__":
    key = jax.random.PRNGKey(0)
    k_param, k_x1, k_x2 = jax.random.split(key, 3)

    params = init_params(k_param)
    packed = pack_params(params)           # one-time repacking, outside the per-call path

    x1 = jax.random.normal(k_x1, (1, 1, INPUT_SIZE), dtype=jnp.float32)
    x2 = jax.random.normal(k_x2, (1, 1, INPUT_SIZE), dtype=jnp.float32)
    hidden0 = jnp.zeros((1, 1, HIDDEN), dtype=jnp.float32)

    fwd = jax.jit(model_forward)

    # Two chained steps: the second exercises a non-zero hidden state.
    logits1, hidden1 = fwd(x1, hidden0, packed)
    logits2, hidden2 = fwd(x2, hidden1, packed)
    jax.block_until_ready((logits1, hidden1, logits2, hidden2))

    assert logits1.shape == (1, ACTION_SPACE) and logits2.shape == (1, ACTION_SPACE)
    assert hidden1.shape == (1, 1, HIDDEN) and hidden2.shape == (1, 1, HIDDEN)

    # Tolerance check vs. the unfused reference (the dense-stack fusion reassociates floats).
    r_logits1, r_hidden1 = reference_forward(x1, hidden0, params)
    r_logits2, r_hidden2 = reference_forward(x2, r_hidden1, params)
    for got, want in ((logits1, r_logits1), (hidden1, r_hidden1),
                      (logits2, r_logits2), (hidden2, r_hidden2)):
        assert float(jnp.max(jnp.abs(got - want))) < 1e-2

    print("KERNEL_OK")
</pallas_src>

<mosaic_0001>
module attributes {stable_mosaic.version = 11 : i64} {
  func.func @model_kernel(%arg0: memref<3xf32, #tpu.memory_space<smem>>, %arg1: memref<1x128xf32, #tpu.memory_space<vmem>>, %arg2: memref<4x384xf32, #tpu.memory_space<vmem>>, %arg3: memref<128x384xf32, #tpu.memory_space<vmem>>, %arg4: memref<1x384xf32, #tpu.memory_space<vmem>>, %arg5: memref<128x128xf32, #tpu.memory_space<vmem>>, %arg6: memref<1x128xf32, #tpu.memory_space<vmem>>, %arg7: memref<1x128xf32, #tpu.memory_space<vmem>>, %arg8: memref<1x128xf32, #tpu.memory_space<vmem>>) attributes {dimension_semantics = [], scalar_prefetch = 0 : i64, scratch_operands = 0 : i64, tpu.core_type = #tpu.core_type<tc>} {
    %c0 = arith.constant 0 : index
    %c0_0 = arith.constant 0 : index
    %0 = vector.load %arg1[%c0, %c0_0] : memref<1x128xf32, #tpu.memory_space<vmem>>, vector<1x128xf32>
    %c0_1 = arith.constant 0 : index
    %1 = memref.load %arg0[%c0_1] : memref<3xf32, #tpu.memory_space<smem>>
    %c1 = arith.constant 1 : index
    %2 = memref.load %arg0[%c1] : memref<3xf32, #tpu.memory_space<smem>>
    %c2 = arith.constant 2 : index
    %3 = memref.load %arg0[%c2] : memref<3xf32, #tpu.memory_space<smem>>
    %c3 = arith.constant 3 : index
    %c0_2 = arith.constant 0 : index
    %4 = vector.load %arg2[%c3, %c0_2] : memref<4x384xf32, #tpu.memory_space<vmem>>, vector<1x384xf32>
    %c0_3 = arith.constant 0 : index
    %c0_4 = arith.constant 0 : index
    %5 = vector.load %arg2[%c0_3, %c0_4] : memref<4x384xf32, #tpu.memory_space<vmem>>, vector<1x384xf32>
    %6 = vector.broadcast %1 : f32 to vector<1x384xf32>
    %7 = arith.mulf %6, %5 : vector<1x384xf32>
    %8 = arith.addf %4, %7 : vector<1x384xf32>
    %c1_5 = arith.constant 1 : index
    %c0_6 = arith.constant 0 : index
    %9 = vector.load %arg2[%c1_5, %c0_6] : memref<4x384xf32, #tpu.memory_space<vmem>>, vector<1x384xf32>
    %10 = vector.broadcast %2 : f32 to vector<1x384xf32>
    %11 = arith.mulf %10, %9 : vector<1x384xf32>
    %12 = arith.addf %8, %11 : vector<1x384xf32>
    %c2_7 = arith.constant 2 : index
    %c0_8 = arith.constant 0 : index
    %13 = vector.load %arg2[%c2_7, %c0_8] : memref<4x384xf32, #tpu.memory_space<vmem>>, vector<1x384xf32>
    %14 = vector.broadcast %3 : f32 to vector<1x384xf32>
    %15 = arith.mulf %14, %13 : vector<1x384xf32>
    %16 = arith.addf %12, %15 : vector<1x384xf32>
    %c0_9 = arith.constant 0 : index
    %c0_10 = arith.constant 0 : index
    %17 = vector.load %arg3[%c0_9, %c0_10] : memref<128x384xf32, #tpu.memory_space<vmem>>, vector<128x384xf32>
    %cst = arith.constant dense<0.000000e+00> : vector<1x384xf32>
    %18 = tpu.matmul %0, %17, %cst {dimension_numbers = #tpu.dot_dimension_numbers<[1], [0], [0], [1], [0, 0, 1, 1], [], []>} : vector<1x128xf32>, vector<128x384xf32>, vector<1x384xf32> -> vector<1x384xf32>
    %c0_11 = arith.constant 0 : index
    %c0_12 = arith.constant 0 : index
    %19 = vector.load %arg4[%c0_11, %c0_12] : memref<1x384xf32, #tpu.memory_space<vmem>>, vector<1x384xf32>
    %20 = arith.addf %18, %19 : vector<1x384xf32>
    %21 = vector.extract_strided_slice %16 {offsets = [0, 0], sizes = [1, 256], strides = [1, 1]} : vector<1x384xf32> to vector<1x256xf32>
    %22 = vector.extract_strided_slice %20 {offsets = [0, 0], sizes = [1, 256], strides = [1, 1]} : vector<1x384xf32> to vector<1x256xf32>
    %23 = arith.addf %21, %22 : vector<1x256xf32>
    %24 = arith.negf %23 : vector<1x256xf32>
    %25 = math.exp %24 : vector<1x256xf32>
    %cst_13 = arith.constant 1.000000e+00 : f32
    %26 = vector.broadcast %cst_13 : f32 to vector<1x256xf32>
    %27 = arith.addf %26, %25 : vector<1x256xf32>
    %28 = arith.divf %26, %27 : vector<1x256xf32>
    %29 = vector.extract_strided_slice %28 {offsets = [0, 0], sizes = [1, 128], strides = [1, 1]} : vector<1x256xf32> to vector<1x128xf32>
    %30 = vector.extract_strided_slice %28 {offsets = [0, 128], sizes = [1, 128], strides = [1, 1]} : vector<1x256xf32> to vector<1x128xf32>
    %31 = vector.extract_strided_slice %16 {offsets = [0, 256], sizes = [1, 128], strides = [1, 1]} : vector<1x384xf32> to vector<1x128xf32>
    %32 = vector.extract_strided_slice %20 {offsets = [0, 256], sizes = [1, 128], strides = [1, 1]} : vector<1x384xf32> to vector<1x128xf32>
    %33 = arith.mulf %29, %32 : vector<1x128xf32>
    %34 = arith.addf %31, %33 : vector<1x128xf32>
    %35 = math.tanh %34 : vector<1x128xf32>
    %cst_14 = arith.constant 1.000000e+00 : f32
    %36 = vector.broadcast %cst_14 : f32 to vector<1x128xf32>
    %37 = arith.subf %36, %30 : vector<1x128xf32>
    %38 = arith.mulf %37, %35 : vector<1x128xf32>
    %39 = arith.mulf %30, %0 : vector<1x128xf32>
    %40 = arith.addf %38, %39 : vector<1x128xf32>
    %c0_15 = arith.constant 0 : index
    %c0_16 = arith.constant 0 : index
    %41 = vector.load %arg8[%c0_15, %c0_16] : memref<1x128xf32, #tpu.memory_space<vmem>>, vector<1x128xf32>
    tpu.vector_store %arg8[%c0_15, %c0_16], %40 {strides = array<i32>} : memref<1x128xf32, #tpu.memory_space<vmem>>, vector<1x128xf32>,
    %c0_17 = arith.constant 0 : index
    %c0_18 = arith.constant 0 : index
    %42 = vector.load %arg5[%c0_17, %c0_18] : memref<128x128xf32, #tpu.memory_space<vmem>>, vector<128x128xf32>
    %cst_19 = arith.constant dense<0.000000e+00> : vector<1x128xf32>
    %43 = tpu.matmul %40, %42, %cst_19 {dimension_numbers = #tpu.dot_dimension_numbers<[1], [0], [0], [1], [0, 0, 1, 1], [], []>} : vector<1x128xf32>, vector<128x128xf32>, vector<1x128xf32> -> vector<1x128xf32>
    %c0_20 = arith.constant 0 : index
    %c0_21 = arith.constant 0 : index
    %44 = vector.load %arg6[%c0_20, %c0_21] : memref<1x128xf32, #tpu.memory_space<vmem>>, vector<1x128xf32>
    %45 = arith.addf %43, %44 : vector<1x128xf32>
    %c0_22 = arith.constant 0 : index
    %c0_23 = arith.constant 0 : index
    %46 = vector.load %arg7[%c0_22, %c0_23] : memref<1x128xf32, #tpu.memory_space<vmem>>, vector<1x128xf32>
    tpu.vector_store %arg7[%c0_22, %c0_23], %45 {strides = array<i32>} : memref<1x128xf32, #tpu.memory_space<vmem>>, vector<1x128xf32>,
    return
  }
}

</mosaic_0001>

<bundles_post_ra>
// kernel: model_forward.1
= control target key start
LH: loop header
LB: loop body
LE: loop exit
PB: predicated region body
PF: predicated region fallthrough
CT: control target
= control target key end

     0   :  { %14 = vsyncpa [#allocation5], 0  ;;  %s923_s0 = inlined_call_operand.vmem [shape: f32[3], index: 0, kind: input, shape index: {}]   ;;  %s924_s1 = inlined_call_operand.vmem [shape: f32[1,128], index: 1, kind: input, shape index: {}, may-alias: {1,8}]   ;;  %s925_s2 = inlined_call_operand.hbm [shape: f32[4,384], index: 2, kind: input, shape index: {}]   ;;  %s926_s3 = inlined_call_operand.hbm [shape: f32[128,384], index: 3, kind: input, shape index: {}]   ;;  %s927_s4 = inlined_call_operand.vmem [shape: f32[1,384], index: 4, kind: input, shape index: {}]   ;;  %s928_s5 = inlined_call_operand.hbm [shape: f32[128,128], index: 5, kind: input, shape index: {}]   ;;  %s929_s6 = inlined_call_operand.vmem [shape: f32[1,128], index: 6, kind: input, shape index: {}]   ;;  %s930_s7 = inlined_call_operand.hbm [shape: f32[1,128], index: 7, kind: output, shape index: {0}]   ;;  %s931_s8 = inlined_call_operand.vmem [shape: f32[1,128], index: 8, kind: output, shape index: {1}, may-alias: {1,8}]  }
   0x1   :  { %15 = vsyncpa [#allocation3], 0 }
   0x2   :  { %16 = vsyncpa [#allocation8], 0 }
   0x3   :  { %17 = vsyncpa [#allocation4], 0  ;;  %s769_s27 = smov [#allocation7]   ;;  %s24_s9 = sshll.u32 %s923_s0, 4  ;;  %s25_s9 = int_to_ptr.vmem [resolvable:$true] %s24_s9 }
   0x4   :  { %s45_s28 = sshll.u32 %s769_s27, 4  ;;  %s661_s12 = scalar_lea.hbm %s926_s3, 6144  ;;  %s46_s28 = int_to_ptr.vmem [resolvable:$true] %s45_s28 }
   0x5   :  { %p662_p0 = scmp.ne.s32.totalorder %s926_s3, %s661_s12  ;;  %p665_p1 = scmp.lt.u32.totalorder %s661_s12, %s926_s3 }
   0x7   :  { %p667_p2 = pnand %p665_p1, %p662_p0 }
   0x9   :  { %670 = shalt.err (!%p667_p2)
}
   0xa   :  { %s671_s17 = scalar_lea.vmem %s46_s28, 6144  ;;  %p676_p4 = scmp.lt.s32.totalorder %s46_s28, %s46_s28 }
   0xb   :  { %p672_p3 = scmp.ne.s32.totalorder %s46_s28, %s671_s17  ;;  %p677_p5 = scmp.lt.s32.totalorder %s671_s17, %s671_s17 }
   0xd   :  { %p678_p6 = por %p677_p5, %p676_p4 }
   0xf   :  { %p679_p7 = pnand %p678_p6, %p672_p3 }
  0x11   :  { %682 = shalt.err (!%p679_p7)
}
  0x12   :  { %s770_s0 = smov 384   ;;  %s771_s18 = smov 24  }
  0x13   :  { %51 = dma.hbm_to_vmem [thread:$0]  %s926_s3, 6144, %s46_s28, [#allocation8], %s770_s0, %s770_s0, %s771_s18  }
  0x14   :  { %s683_s21 = scalar_lea.vmem %s25_s9, 16  ;;  %p688_p9 = scmp.lt.s32.totalorder %s25_s9, %s25_s9 }
  0x15   :  { %p684_p8 = scmp.ne.s32.totalorder %s25_s9, %s683_s21  ;;  %p689_p10 = scmp.lt.s32.totalorder %s683_s21, %s683_s21 }
  0x17   :  { %p690_p11 = por %p689_p10, %p688_p9 }
  0x19   :  { %p691_p12 = pnand %p690_p11, %p684_p8 }
  0x1b   :  { %694 = shalt.err (!%p691_p12)
}
  0x1c   :  { %s772_s22 = smov [#allocation2]   ;;  %s773_s23 = smov [#allocation6]  }
  0x1d   :  { %27 = dma.vmem_to_smem %s25_s9, 16, %s772_s22, [#allocation5]  }
  0x1e   :  { %s36_s24 = sshll.u32 %s773_s23, 4  ;;  %s774_s25 = smov [#allocation9]   ;;  %s37_s24 = int_to_ptr.vmem [resolvable:$true] %s36_s24 }
  0x1f   :  { %s59_s26 = sshll.u32 %s774_s25, 4  ;;  %s695_s3 = scalar_lea.hbm %s925_s2, 192  ;;  %s842_s26 = int_to_ptr.vmem [resolvable:$true] %s59_s26 }
  0x20   :  { %p696_p13 = scmp.ne.s32.totalorder %s925_s2, %s695_s3  ;;  %p699_p0 = scmp.lt.u32.totalorder %s695_s3, %s925_s2 }
  0x22   :  { %p701_p1 = pnand %p699_p0, %p696_p13 }
  0x24   :  { %704 = shalt.err (!%p701_p1)
}
  0x25   :  { %s705_s9 = scalar_lea.vmem %s37_s24, 192  ;;  %p710_p3 = scmp.lt.s32.totalorder %s37_s24, %s37_s24 }
  0x26   :  { %p706_p2 = scmp.ne.s32.totalorder %s37_s24, %s705_s9  ;;  %p711_p4 = scmp.lt.s32.totalorder %s705_s9, %s705_s9 }
  0x28   :  { %p712_p5 = por %p711_p4, %p710_p3 }
  0x2a   :  { %p713_p6 = pnand %p712_p5, %p706_p2 }
  0x2c   :  { %716 = shalt.err (!%p713_p6)
}
  0x2d   :  { %39 = dma.hbm_to_vmem [thread:$0]  %s925_s2, 192, %s37_s24, [#allocation3]  }
  0x2e   :  { %s717_s16 = scalar_lea.hbm %s928_s5, 2048 }
  0x2f   :  { %p718_p7 = scmp.ne.s32.totalorder %s928_s5, %s717_s16  ;;  %p721_p8 = scmp.lt.u32.totalorder %s717_s16, %s928_s5 }
  0x31   :  { %p723_p9 = pnand %p721_p8, %p718_p7 }
  0x33   :  { %726 = shalt.err (!%p723_p9)
}
  0x34   :  { %s727_s20 = scalar_lea.vmem %s842_s26, 2048  ;;  %p732_p11 = scmp.lt.s32.totalorder %s842_s26, %s842_s26 }
  0x35   :  { %p728_p10 = scmp.ne.s32.totalorder %s842_s26, %s727_s20  ;;  %p733_p12 = scmp.lt.s32.totalorder %s727_s20, %s727_s20 }
  0x37   :  { %p734_p13 = por %p733_p12, %p732_p11 }
  0x39   :  { %p735_p0 = pnand %p734_p13, %p728_p10 }
  0x3b   :  { %738 = shalt.err (!%p735_p0)
}
  0x3c   :  { %s775_s2 = smov 128   ;;  %s776_s21 = smov 8  }
  0x3d   :  { %65 = dma.hbm_to_vmem [thread:$0]  %s928_s5, 2048, %s842_s26, [#allocation8], %s775_s2, %s775_s2, %s776_s21  }
  0x3e   :  { %761 = dma.done.wait [#allocation5], 16  }
  0x3f   :  { %762 = vsyncadd [#allocation5], 4294967280 }
  0x40   :  { %763 = dma.done.wait [#allocation3], 192  }
  0x41   :  { %764 = vsyncadd [#allocation3], 4294967104 }
  0x42   :  { %765 = dma.done.wait [#allocation8], 8192  }
  0x43   :  { %766 = vsyncadd [#allocation8], 4294959104 }
  0x44   :  { %80 = sfence }
  0x45   :  { %v102_v0 = vld [vmem:[#allocation7 + $0x8] sm:$0xff]  ;;  %v105_v1 = vld [vmem:[#allocation7 + $0x20] sm:$0xff]  ;;  %v104_v4 = vld [vmem:[#allocation7 + $0x18] sm:$0xff]  ;;  %v777_v7 = vmov 0.0   ;;  %v778_v8 = vmov 0.0|0.0   ;;  %vm779_vm0 = vmmov 0  }
  0x46   :  { %v101_v2 = vld [vmem:[#allocation7] sm:$0xff]  ;;  %v562_v3 = vpack.c.bf16 %v105_v1, %v102_v0  ;;  %v108_v5 = vld [vmem:[#allocation7 + $0x38] sm:$0xff]  ;;  %v111_v6 = vld [vmem:[#allocation7 + $0x50] sm:$0xff]  ;;  %230 = vmatprep.mubr.f32.mxu0 %v777_v7  ;;  %594 = vmatprep.subr.bf16.mxu1 %v778_v8  ;;  %s455_s25 = sld [smem:[#allocation2 + $0x1]]  ;;  %s456_s26 = sld [smem:[#allocation2 + $0x2]] }
  0x47   :  { %v564_v9 = vpack.c.bf16 %v104_v4, %v101_v2  ;;  %v566_v10 = vpack.c.bf16 %v111_v6, %v108_v5  ;;  %v107_v11 = vld [vmem:[#allocation7 + $0x30] sm:$0xff]  ;;  %v110_v12 = vld [vmem:[#allocation7 + $0x48] sm:$0xff]  ;;  %524 = vmatprep.mubr.msk.f32.mxu1 %vm779_vm0, %v777_v7  ;;  %v117_v14 = vld [vmem:[#allocation7 + $0x80] sm:$0xff]  ;;  %s781_s10 = smov [#allocation10]  }
  0x48   :  { %v114_v13 = vld [vmem:[#allocation7 + $0x68] sm:$0xff]  ;;  %563 = vmatprep.subr.bf16.mxu0 %v562_v3  ;;  %v568_v15 = vpack.c.bf16 %v110_v12, %v107_v11  ;;  %v113_v17 = vld [vmem:[#allocation7 + $0x60] sm:$0xff]  ;;  %v116_v18 = vld [vmem:[#allocation7 + $0x78] sm:$0xff]  ;;  %s440_s11 = sshll.u32 %s781_s10, 4  ;;  %s441_s11 = int_to_ptr.vmem [resolvable:$true] %s440_s11 }
  0x49   :  { %565 = vmatpush1.bf16.msra.mxu0 %v564_v9  ;;  %v570_v16 = vpack.c.bf16 %v117_v14, %v114_v13  ;;  %v120_v19 = vld [vmem:[#allocation7 + $0x98] sm:$0xff]  ;;  %v123_v20 = vld [vmem:[#allocation7 + $0xb0] sm:$0xff]  ;;  %v572_v21 = vpack.c.bf16 %v116_v18, %v113_v17  ;;  %v122_v24 = vld [vmem:[#allocation7 + $0xa8] sm:$0xff]  ;;  %s739_s9 = scalar_lea.vmem %s441_s11, 16  ;;  %s743_s12 = scalar_lea.vmem %s441_s11, 32 }
  0x4a   :  { %567 = vmatprep.subr.bf16.mxu0 %v566_v10  ;;  %v574_v22 = vpack.c.bf16 %v123_v20, %v120_v19  ;;  %v119_v23 = vld [vmem:[#allocation7 + $0x90] sm:$0xff]  ;;  %v126_v25 = vld [vmem:[#allocation7 + $0xc8] sm:$0xff]  ;;  %v129_v26 = vld [vmem:[#allocation7 + $0xe0] sm:$0xff]  ;;  %p740_p1 = scmp.ne.s32.totalorder %s441_s11, %s739_s9  ;;  %p744_p2 = scmp.lt.s32.totalorder %s441_s11, %s441_s11 }
  0x4b   :  { %v103_v27 = vld [vmem:[#allocation7 + $0x10] sm:$0xff]  ;;  %v106_v28 = vld [vmem:[#allocation7 + $0x28] sm:$0xff]  ;;  %v109_v29 = vld [vmem:[#allocation7 + $0x40] sm:$0xff]  ;;  %v576_v30 = vpack.c.bf16 %v122_v24, %v119_v23  ;;  %v578_v33 = vpack.c.bf16 %v129_v26, %v126_v25  ;;  %p745_p3 = scmp.lt.s32.totalorder %s743_s12, %s739_s9 }
  0x4c   :  { %v595_v31 = vpack.c.bf16 %v106_v28, %v103_v27  ;;  %v112_v32 = vld [vmem:[#allocation7 + $0x58] sm:$0xff]  ;;  %v125_v34 = vld [vmem:[#allocation7 + $0xc0] sm:$0xff]  ;;  %v135_v37 = vld [vmem:[#allocation7 + $0x110] sm:$0xff] }
  0x4d   :  { %569 = vmatpush1.bf16.msra.mxu0 %v568_v15  ;;  %v128_v35 = vld [vmem:[#allocation7 + $0xd8] sm:$0xff]  ;;  %v598_v38 = vpack.c.bf16 %v112_v32, %v109_v29  ;;  %v115_v39 = vld [vmem:[#allocation7 + $0x70] sm:$0xff]  ;;  %v118_v40 = vld [vmem:[#allocation7 + $0x88] sm:$0xff]  ;;  %p746_p4 = por %p745_p3, %p744_p2 }
  0x4e   :  { %571 = vmatprep.subr.bf16.mxu0 %v570_v16  ;;  %v132_v36 = vld [vmem:[#allocation7 + $0xf8] sm:$0xff]  ;;  %596 = vmatpush3.bf16.msra.mxu1 %v595_v31  ;;  %v580_v41 = vpack.c.bf16 %v128_v35, %v125_v34  ;;  %v131_v43 = vld [vmem:[#allocation7 + $0xf0] sm:$0xff]  ;;  %v134_v44 = vld [vmem:[#allocation7 + $0x108] sm:$0xff]  ;;  %v601_v47 = vpack.c.bf16 %v118_v40, %v115_v39 }
  0x4f   :  { %597 = vmatprep.subr.bf16.mxu1 %v778_v8  ;;  %v582_v42 = vpack.c.bf16 %v135_v37, %v132_v36  ;;  %v138_v45 = vld [vmem:[#allocation7 + $0x128] sm:$0xff]  ;;  %v141_v46 = vld [vmem:[#allocation7 + $0x140] sm:$0xff]  ;;  %v124_v49 = vld [vmem:[#allocation7 + $0xb8] sm:$0xff]  ;;  %v584_v50 = vpack.c.bf16 %v134_v44, %v131_v43  ;;  %v151_v36 = vlaneseq  ;;  %v780_v44 = vmov 1966171168   ;;  %p747_p5 = pnand %p746_p4, %p740_p1 }
  0x50   :  { %v121_v48 = vld [vmem:[#allocation7 + $0xa0] sm:$0xff]  ;;  %v586_v51 = vpack.c.bf16 %v141_v46, %v138_v45  ;;  %v140_v53 = vld [vmem:[#allocation7 + $0x138] sm:$0xff]  ;;  %v147_v55 = vld [vmem:[#allocation7 + $0x170] sm:$0xff]  ;;  %v311_v45 = vunpack.c.l.s4 %v780_v44 }
  0x51   :  { %573 = vmatpush1.bf16.msra.mxu0 %v572_v21  ;;  %v137_v52 = vld [vmem:[#allocation7 + $0x120] sm:$0xff]  ;;  %v144_v54 = vld [vmem:[#allocation7 + $0x158] sm:$0xff]  ;;  %v604_v56 = vpack.c.bf16 %v124_v49, %v121_v48  ;;  %v127_v57 = vld [vmem:[#allocation7 + $0xd0] sm:$0xff]  ;;  %v152_v37 = vshrl.u32 %v151_v36, 7 }
  0x52   :  { %575 = vmatprep.subr.bf16.mxu0 %v574_v22  ;;  %599 = vmatpush3.bf16.msra.mxu1 %v598_v38  ;;  %v130_v58 = vld [vmem:[#allocation7 + $0xe8] sm:$0xff]  ;;  %v588_v59 = vpack.c.bf16 %v140_v53, %v137_v52  ;;  %v590_v60 = vpack.c.bf16 %v147_v55, %v144_v54  ;;  %v143_v61 = vld [vmem:[#allocation7 + $0x150] sm:$0xff]  ;;  %v133_v0 = vld [vmem:[#allocation7 + $0x100] sm:$0xff]  ;;  %v312_v52 = vunpack.c.0.s8 %v311_v45  ;;  %v98_v54 = vstv %s456_s26 }
  0x53   :  { %600 = vmatprep.subr.bf16.mxu1 %v778_v8  ;;  %v146_v62 = vld [vmem:[#allocation7 + $0x168] sm:$0xff]  ;;  %v607_v63 = vpack.c.bf16 %v130_v58, %v127_v57  ;;  %v136_v1 = vld [vmem:[#allocation7 + $0x118] sm:$0xff]  ;;  %v139_v4 = vld [vmem:[#allocation7 + $0x130] sm:$0xff]  ;;  %v153_v40 = vsub.s32 0, %v152_v37  ;;  %v157_v43 = vsub.s32 1, %v152_v37 }
  0x54   :  { %v592_v2 = vpack.c.bf16 %v146_v62, %v143_v61  ;;  %v610_v3 = vpack.c.bf16 %v136_v1, %v133_v0  ;;  %v142_v5 = vld [vmem:[#allocation7 + $0x148] sm:$0xff]  ;;  %v885_v6 = vld [vmem:[%s924_s1] sm:$0x1]  ;;  %v145_v10 = vld [vmem:[#allocation7 + $0x160] sm:$0xff]  ;;  %s82_s1 = sld [smem:[#allocation2]]  ;;  %v315_v61 = vsub.s32 %v312_v52, %v152_v37 }
  0x55   :  { %577 = vmatpush1.bf16.msra.mxu0 %v576_v30  ;;  %v613_v9 = vpack.c.bf16 %v142_v5, %v139_v4  ;;  %v148_v11 = vld [vmem:[#allocation7 + $0x178] sm:$0xff]  ;;  %v346_v13 = vld [vmem:[#allocation9] sm:$0xff]  ;;  %v347_v14 = vld [vmem:[#allocation9 + $0x8] sm:$0xff] }
  0x56   :  { %579 = vmatprep.subr.bf16.mxu0 %v578_v33  ;;  %602 = vmatpush3.bf16.msra.mxu1 %v601_v47  ;;  %v616_v12 = vpack.c.bf16 %v148_v11, %v145_v10  ;;  %v619_v15 = vpack.c.bf16 %v347_v14, %v346_v13  ;;  %v348_v16 = vld [vmem:[#allocation9 + $0x10] sm:$0xff]  ;;  %v349_v17 = vld [vmem:[#allocation9 + $0x18] sm:$0xff]  ;;  %v351_v19 = vld [vmem:[#allocation9 + $0x28] sm:$0xff]  ;;  %v161_v11 = vsub.s32 2, %v152_v37 }
  0x57   :  { %603 = vmatprep.subr.bf16.mxu1 %v778_v8  ;;  %v622_v18 = vpack.c.bf16 %v349_v17, %v348_v16  ;;  %v352_v21 = vld [vmem:[#allocation9 + $0x30] sm:$0xff]  ;;  %v353_v22 = vld [vmem:[#allocation9 + $0x38] sm:$0xff]  ;;  %v354_v24 = vld [vmem:[#allocation9 + $0x40] sm:$0xff] }
  0x58   :  { %v628_v23 = vpack.c.bf16 %v353_v22, %v352_v21  ;;  %v355_v25 = vld [vmem:[#allocation9 + $0x48] sm:$0xff]  ;;  %v356_v27 = vld [vmem:[#allocation9 + $0x50] sm:$0xff]  ;;  %v357_v28 = vld [vmem:[#allocation9 + $0x58] sm:$0xff] }
  0x59   :  { %581 = vmatpush1.bf16.msra.mxu0 %v580_v41  ;;  %v631_v26 = vpack.c.bf16 %v355_v25, %v354_v24  ;;  %v634_v29 = vpack.c.bf16 %v357_v28, %v356_v27  ;;  %v358_v30 = vld [vmem:[#allocation9 + $0x60] sm:$0xff]  ;;  %v359_v31 = vld [vmem:[#allocation9 + $0x68] sm:$0xff]  ;;  %v360_v33 = vld [vmem:[#allocation9 + $0x70] sm:$0xff] }
  0x5a   :  { %583 = vmatprep.subr.bf16.mxu0 %v582_v42  ;;  %605 = vmatpush3.bf16.msra.mxu1 %v604_v56  ;;  %v637_v32 = vpack.c.bf16 %v359_v31, %v358_v30  ;;  %v361_v34 = vld [vmem:[#allocation9 + $0x78] sm:$0xff]  ;;  %v88_v39 = vstv %s82_s1  ;;  %v149_v41 = vld [vmem:[%s927_s4] sm:$0x7] }
  0x5b   :  { %606 = vmatprep.subr.bf16.mxu1 %v778_v8  ;;  %v640_v35 = vpack.c.bf16 %v361_v34, %v360_v33  ;;  %v87_v38 = vld [vmem:[#allocation6] ss:$4 sm:$0x7]  ;;  %v86_v46 = vld [vmem:[#allocation6 + $0x3] ss:$4 sm:$0x7]  ;;  %v154_v48 = vrot.slane %v149_v41, %v153_v40 }
  0x5c   :  { %v89_v42 = vmul.f32 %v88_v39, %v87_v38  ;;  %v92_v47 = vld [vmem:[#allocation6 + $0x1] ss:$4 sm:$0x7]  ;;  %v97_v53 = vld [vmem:[#allocation6 + $0x2] ss:$4 sm:$0x7] }
  0x5d   :  { %585 = vmatpush1.bf16.msra.mxu0 %v584_v50 }
  0x5e   :  { %587 = vmatprep.subr.bf16.mxu0 %v586_v51  ;;  %608 = vmatpush3.bf16.msra.mxu1 %v607_v63  ;;  %v90_v49 = vadd.f32 %v89_v42, %v86_v46  ;;  %v158_v51 = vrot.slane %v149_v41, %v157_v43 }
  0x5f   :  { %609 = vmatprep.subr.bf16.mxu1 %v778_v8 }
  0x61   :  { %589 = vmatpush1.bf16.msra.mxu0 %v588_v59  ;;  %v99_v59 = vmul.f32 %v98_v54, %v97_v53 }
  0x62   :  { %591 = vmatprep.subr.bf16.mxu0 %v590_v60  ;;  %611 = vmatpush3.bf16.msra.mxu1 %v610_v3 }
  0x63   :  { %612 = vmatprep.subr.bf16.mxu1 %v778_v8 }
  0x65   :  { %593 = vmatpush1.bf16.msra.mxu0 %v592_v2 }
  0x66   :  { %618 = vmatprep.subr.bf16.mxu0 %v778_v8  ;;  %614 = vmatpush3.bf16.msra.mxu1 %v613_v9 }
  0x67   :  { %615 = vmatprep.subr.bf16.mxu1 %v778_v8 }
  0x68   :  { %231 = vmatmul.mubr.f32.vlgmr.msra.gmra.mrb[0].mxu0 %v885_v6 }
  0x69   :  { %559 = vmatprep.mubr.msk.f32.mxu0 %vm779_vm0, %v777_v7  ;;  %620 = vmatpush3.bf16.msra.mxu0 %v619_v15  ;;  %v350_v7 = vld [vmem:[#allocation9 + $0x20] sm:$0xff] }
  0x6a   :  { %617 = vmatpush3.bf16.msra.mxu1 %v616_v12  ;;  %621 = vmatprep.subr.bf16.mxu0 %v778_v8  ;;  %v625_v20 = vpack.c.bf16 %v351_v19, %v350_v7  ;;  %v162_v12 = vrot.slane %v149_v41, %v161_v11 }
  0x6d   :  { %525 = vmatmul.mubr.f32.vlgmr.msra.gmra.mrb[0].mxu1 %v885_v6  ;;  %623 = vmatpush3.bf16.msra.mxu0 %v622_v18 }
  0x6e   :  { %624 = vmatprep.subr.bf16.mxu0 %v778_v8 }
  0x71   :  { %626 = vmatpush3.bf16.msra.mxu0 %v625_v20 }
  0x72   :  { %627 = vmatprep.subr.bf16.mxu0 %v778_v8 }
  0x75   :  { %629 = vmatpush3.bf16.msra.mxu0 %v628_v23  ;;  %v362_v23 = vld [vmem:[%s929_s6] sm:$0x1] }
  0x76   :  { %630 = vmatprep.subr.bf16.mxu0 %v778_v8 }
  0x79   :  { %632 = vmatpush3.bf16.msra.mxu0 %v631_v26 }
  0x7a   :  { %633 = vmatprep.subr.bf16.mxu0 %v778_v8 }
  0x7d   :  { %635 = vmatpush3.bf16.msra.mxu0 %v634_v29 }
  0x7e   :  { %636 = vmatprep.subr.bf16.mxu0 %v778_v8 }
  0x81   :  { %638 = vmatpush3.bf16.msra.mxu0 %v637_v32 }
  0x82   :  { %639 = vmatprep.subr.bf16.mxu0 %v778_v8  ;;  %v93_v8 = vstv %s455_s25 }
  0x83   :  { %v94_v50 = vmul.f32 %v93_v8, %v92_v47 }
  0x85   :  { %641 = vmatpush3.bf16.msra.mxu0 %v640_v35  ;;  %v95_v58 = vadd.f32 %v94_v50, %v90_v49 }
  0x87   :  { %v100_v63 = vadd.f32 %v99_v59, %v95_v58 }
  0x89   :  { %v334_v14 = vrot.slane %v100_v63, 2 }
 0x13b   :  { %v232_v55 = vpop.f32.mrb[0].mxu0 }
 0x13c   :  { %v233_v56 = vadd.f32 %v232_v55, %v154_v48  ;;  %v234_v57 = vpop.f32.mrb[1].mxu0 }
 0x13d   :  { %v235_v60 = vadd.f32 %v234_v57, %v158_v51 }
 0x13f   :  { %v309_v62 = vcombine.low %v233_v56, %v235_v60 }
 0x140   :  { %v303_v3 = vpop.f32.mrb[0].mxu1 }
 0x141   :  { %v316_v0 = vrot.slane %v309_v62, %v315_v61  ;;  %v526_v4 = vpop.f32.mrb[1].mxu1  ;;  %v304_v13 = vadd.f32 %v303_v3, %v162_v12 }
 0x143   :  { %v323_v1 = vrot.slane %v316_v0, %v315_v61 }
 0x145   :  { %v325_v2 = vadd.f32 %v323_v1, %v100_v63 }
 0x147   :  { %v457_v5 = vmul.f32 -1.442695, %v325_v2 }
 0x149   :  { %655 = vpow2.f32 %v457_v5 }
 0x153   :  { %v656_v9 = vpop.eup %655 }
 0x154   :  { %v329_v10 = vadd.f32 1.0, %v656_v9 }
 0x156   :  { %657 = vrcp.f32 %v329_v10 }
 0x160   :  { %v658_v15 = vpop.eup %657 }
 0x161   :  { %v332_v16 = vmul.f32 %v658_v15, %v304_v13  ;;  %v339_v18 = vrot.slane %v658_v15, 1 }
 0x163   :  { %v336_v17 = vadd.f32 %v334_v14, %v332_v16  ;;  %v341_v7 = vsub.f32 1.0, %v339_v18  ;;  %v343_v21 = vmul.f32 %v339_v18, %v885_v6 }
 0x165   :  { %659 = vtanh.f32 %v336_v17 }
 0x16f   :  { %v660_v19 = vpop.eup %659 }
 0x170   :  { %v342_v20 = vmul.f32 %v660_v19, %v341_v7 }
 0x172   :  { %v344_v22 = vadd.f32 %v343_v21, %v342_v20 }
 0x174   :  { %345 = vst [vmem:[%s931_s8] sm:$0x1] %v344_v22  ;;  %560 = vmatmul.mubr.f32.vlgmr.msra.gmra.mrb[2].mxu0 %v344_v22 }
 0x247   :  { %v429_v24 = vpop.f32.mrb[2].mxu0 }
 0x248   :  { %v430_v25 = vadd.f32 %v429_v24, %v362_v23  ;;  %v561_v26 = vpop.f32.mrb[3].mxu0 }
 0x24a   :  { %433 = vst [vmem:[#allocation10] sm:$0x1] %v430_v25 }
 0x24b   :  { %750 = shalt.err (!%p747_p5)
}
 0x24c   :  { %s751_s14 = scalar_lea.hbm %s930_s7, 16 }
 0x24d   :  { %p752_p6 = scmp.ne.s32.totalorder %s930_s7, %s751_s14  ;;  %p755_p7 = scmp.lt.u32.totalorder %s751_s14, %s930_s7 }
 0x24f   :  { %p757_p8 = pnand %p755_p7, %p752_p6 }
 0x251   :  { %760 = shalt.err (!%p757_p8)
}
 0x252   :  { %443 = dma.vmem_to_hbm [thread:$0]  %s441_s11, 16, %s930_s7, [#allocation4]  }
 0x253   :  { %767 = dma.done.wait [#allocation4], 16  }
 0x254   :  { %768 = vsyncadd [#allocation4], 4294967280 }
 0x255   :  { %451 = vsyncpa [#allocation3], 1 }
 0x256   :  { %452 = vsyncpa [#allocation8], 1 }
 0x257   :  { %453 = vsyncpa [#allocation4], 1 }
 0x258   :  { %454 = vsyncpa [#allocation5], 1 }

</bundles_post_ra>
